<compile_context>
chip_gen: v7x
topology: tpu7x:2x2x1
jax: 0.10.0
libtpu: 0.0.40
codegen_flags: <defaults>
</compile_context>

<pallas_src>
import functools

import jax
import jax.numpy as jnp
from jax.experimental import pallas as pl
from jax.experimental.pallas import tpu as pltpu


def _int_pow(x, n):
    """x ** n for positive integer n via square-and-multiply (VPU muls only)."""
    result = None
    base = x
    while n > 0:
        if n & 1:
            result = base if result is None else result * base
        n >>= 1
        if n:
            base = base * base
    return result


def _gem_kernel(x_ref, o_ref, *, p, eps, hw):
    # x_ref: (TM, HW) in the input's native dtype; o_ref: (1, 1, TM).
    x = x_ref[...].astype(jnp.float32)            # upcast in-register (hidden under DMA)
    x = jnp.maximum(x, eps)                       # clamp(min=eps)
    if float(p).is_integer() and p >= 1.0:
        xp = _int_pow(x, int(p))                  # p=3 -> x*x*x: VPU only, no EUP log/exp
    else:
        xp = jnp.power(x, p)                      # general (non-integer p) fallback
    mean = jnp.sum(xp, axis=-1, keepdims=True) * (1.0 / hw)   # (TM, 1) avg over H*W
    res = jnp.power(mean, 1.0 / p)                # only TM elements -> cheap
    tm = o_ref.shape[-1]
    o_ref[...] = res.reshape(1, 1, tm).astype(o_ref.dtype)    # lane-dense store


def gem_pallas(x, p=3.0, eps=1e-6):
    """x: (N, C, H, W) -> (N, C, 1, 1), matching PyTorch GeM.forward."""
    N, C, H, W = x.shape
    nc = N * C
    hw = H * W
    xf = x.reshape(nc, hw)                        # native dtype, no wrapper upcast

    # Row-tile budget: keep the f32 working tile <= ~4 MiB so double-buffered
    # input + temporaries fit all generations (incl. v7x's 64 MiB VMEM).
    bytes_per_row_f32 = hw * 4
    tm_cap = max(8, ((4 * 1024 * 1024) // bytes_per_row_f32) // 8 * 8)
    tm = min(512, tm_cap)
    if tm >= nc:
        tm = nc                                   # single block == full dim is allowed
        num_tiles = 1
    else:
        num_tiles = pl.cdiv(nc, tm)               # tail tile padding rows are sliced off
    # TODO(synk): for extreme H*W (row > ~4 MiB) the reduction axis itself
    # would need tiling with a VMEM accumulator; not needed for GeM's usual
    # 7x7 / 14x14 / 16x16 feature maps.

    kernel = functools.partial(
        _gem_kernel, p=float(p), eps=float(eps), hw=float(hw)
    )

    out = pl.pallas_call(
        kernel,
        out_shape=jax.ShapeDtypeStruct((num_tiles, 1, tm), x.dtype),
        grid=(num_tiles,),
        in_specs=[pl.BlockSpec((tm, hw), lambda i: (i, 0))],
        out_specs=pl.BlockSpec((1, 1, tm), lambda i: (i, 0, 0)),
        compiler_params=pltpu.CompilerParams(
            dimension_semantics=("parallel",),    # lets v7x split rows across its 2 TCs
        ),
    )(xf)

    # Drop padded tail rows (if any) and restore (N, C, 1, 1).
    return out.reshape(num_tiles * tm)[:nc].reshape(N, C, 1, 1)


class GeM:
    """Mirror of the PyTorch module (p_trainable=False -> p is a plain scalar)."""

    def __init__(self, p=3, eps=1e-6, p_trainable=False):
        # TODO(synk): p_trainable=True would make p a learned 1-element param;
        # here it is a static scalar (forward math is identical).
        self.p = float(p)
        self.eps = eps

    def __call__(self, x):
        return gem_pallas(x, p=self.p, eps=self.eps)


def _gem_ref(x, p=3.0, eps=1e-6):
    # Pure-JAX reference for a sanity check.
    xc = jnp.maximum(x.astype(jnp.float32), eps)
    m = jnp.mean(xc ** p, axis=(-2, -1), keepdims=True)
    return m ** (1.0 / p)


if __name__ == "__main__":
    key = jax.random.PRNGKey(0)
    N, C, H, W = 2, 4, 16, 16
    x = jax.random.uniform(key, (N, C, H, W), dtype=jnp.float32)

    gem = GeM(p=3, eps=1e-6)
    out = jax.block_until_ready(gem(x))

    ref = _gem_ref(x, p=3.0, eps=1e-6)
    assert out.shape == (N, C, 1, 1), out.shape
    err = float(jnp.max(jnp.abs(out.astype(jnp.float32) - ref)))
    assert jnp.allclose(out.astype(jnp.float32), ref, atol=1e-5, rtol=1e-5), err
    print("KERNEL_OK")
</pallas_src>

<mosaic_0001>
module attributes {stable_mosaic.version = 11 : i64} {
  func.func @_gem_kernel(%arg0: i32, %arg1: memref<8x256xf32, #tpu.memory_space<vmem>>, %arg2: memref<1x1x8xf32, #tpu.memory_space<vmem>>) attributes {dimension_semantics = [#tpu.dimension_semantics<parallel>], iteration_bounds = array<i64: 1>, scalar_prefetch = 0 : i64, scratch_operands = 0 : i64, tpu.core_type = #tpu.core_type<tc>, window_params = [{transform_indices = @transform_0, window_bounds = array<i64: 8, 256>}, {transform_indices = @transform_1, window_bounds = array<i64: 1, 1, 8>}]} {
    %c0 = arith.constant 0 : index
    %c0_0 = arith.constant 0 : index
    %0 = vector.load %arg1[%c0, %c0_0] : memref<8x256xf32, #tpu.memory_space<vmem>>, vector<8x256xf32>
    %cst = arith.constant 9.99999997E-7 : f32
    %1 = vector.broadcast %cst : f32 to vector<8x256xf32>
    %2 = arith.maximumf %0, %1 : vector<8x256xf32>
    %3 = arith.mulf %2, %2 : vector<8x256xf32>
    %4 = arith.mulf %2, %3 : vector<8x256xf32>
    %cst_1 = arith.constant dense<0.000000e+00> : vector<8xf32>
    %5 = vector.multi_reduction <add>, %4, %cst_1 [1] : vector<8x256xf32> to vector<8xf32>
    %6 = vector.shape_cast %5 : vector<8xf32> to vector<8x1xf32>
    %cst_2 = arith.constant 3.906250e-03 : f32
    %7 = vector.broadcast %cst_2 : f32 to vector<8x1xf32>
    %8 = arith.mulf %6, %7 : vector<8x1xf32>
    %cst_3 = arith.constant 0.333333343 : f32
    %9 = vector.broadcast %cst_3 : f32 to vector<8x1xf32>
    %10 = math.powf %8, %9 : vector<8x1xf32>
    %11 = vector.shape_cast %10 : vector<8x1xf32> to vector<1x1x8xf32>
    %c0_4 = arith.constant 0 : index
    %c0_5 = arith.constant 0 : index
    %c0_6 = arith.constant 0 : index
    %12 = vector.load %arg2[%c0_4, %c0_5, %c0_6] : memref<1x1x8xf32, #tpu.memory_space<vmem>>, vector<1x1x8xf32>
    tpu.vector_store %arg2[%c0_4, %c0_5, %c0_6], %11 {strides = array<i32>} : memref<1x1x8xf32, #tpu.memory_space<vmem>>, vector<1x1x8xf32>,
    return
  }
  func.func @transform_0(%arg0: i32) -> (i32, i32) {
    %c0_i32 = arith.constant 0 : i32
    %c0_i32_0 = arith.constant 0 : i32
    return %arg0, %c0_i32 : i32, i32
  }
  func.func @transform_1(%arg0: i32) -> (i32, i32, i32) {
    %c0_i32 = arith.constant 0 : i32
    %c0_i32_0 = arith.constant 0 : i32
    %c0_i32_1 = arith.constant 0 : i32
    return %arg0, %c0_i32, %c0_i32_0 : i32, i32, i32
  }
}

</mosaic_0001>

<bundles_post_ra>
// kernel: tpu_custom_call.1
= control target key start
LH: loop header
LB: loop body
LE: loop exit
PB: predicated region body
PF: predicated region fallthrough
CT: control target
= control target key end

     0   :  { %6 = vsyncpa [#allocation3], 0  ;;  %s167_s0 = inlined_call_operand.hbm [shape: f32[8,256], index: 0, kind: input, shape index: {}]   ;;  %s168_s1 = inlined_call_operand.hbm [shape: f32[1,1,8], index: 1, kind: output, shape index: {}]  }
   0x1   :  { %7 = vsyncpa [#allocation4], 0  ;;  %s131_s6 = smov [#allocation2]   ;;  %s83_s10 = scalar_lea.hbm %s167_s0, 256 }
   0x2   :  { %s14_s7 = sshll.u32 %s131_s6, 4  ;;  %p84_p0 = scmp.ne.s32.totalorder %s167_s0, %s83_s10  ;;  %s15_s7 = int_to_ptr.vmem [resolvable:$true] %s14_s7 }
   0x3   :  { %p87_p1 = scmp.lt.u32.totalorder %s83_s10, %s167_s0 }
   0x5   :  { %p89_p2 = pnand %p87_p1, %p84_p0 }
   0x7   :  { %92 = shalt.err (!%p89_p2)
}
   0x8   :  { %s93_s15 = scalar_lea.vmem %s15_s7, 256  ;;  %p98_p4 = scmp.lt.s32.totalorder %s15_s7, %s15_s7 }
   0x9   :  { %p94_p3 = scmp.ne.s32.totalorder %s15_s7, %s93_s15  ;;  %p99_p5 = scmp.lt.s32.totalorder %s93_s15, %s93_s15 }
   0xb   :  { %p100_p6 = por %p99_p5, %p98_p4 }
   0xd   :  { %p101_p7 = pnand %p100_p6, %p94_p3 }
   0xf   :  { %104 = shalt.err (!%p101_p7)
}
  0x10   :  { %17 = dma.hbm_to_vmem [thread:$0]  %s167_s0, 256, %s15_s7, [#allocation3]  }
  0x11   :  { %127 = dma.done.wait [#allocation3], 256  }
  0x12   :  { %128 = vsyncadd [#allocation3], 4294967040  ;;  %v21_v0 = vld [vmem:[#allocation2] sm:$0xff]  ;;  %v22_v1 = vld [vmem:[#allocation2 + $0x8] sm:$0xff]  ;;  %v35_v14 = vlaneseq  ;;  %s132_s0 = smov [#allocation5]   ;;  %vm42_vm5 = vcmask 57344  }
  0x13   :  { %v23_v2 = vmax.f32 %v21_v0, 1e-06  ;;  %v24_v3 = vmax.f32 %v22_v1, 1e-06  ;;  %s50_s18 = sshll.u32 %s132_s0, 4  ;;  %s51_s18 = int_to_ptr.vmem [resolvable:$true] %s50_s18 }
  0x14   :  { %v36_v17 = vand.u32 127, %v35_v14  ;;  %v38_v18 = vshrl.u32 %v35_v14, 7  ;;  %s105_s19 = scalar_lea.vmem %s51_s18, 16  ;;  %s109_s20 = scalar_lea.vmem %s51_s18, 32 }
  0x15   :  { %v25_v4 = vmul.f32 %v23_v2, %v23_v2  ;;  %v26_v5 = vmul.f32 %v24_v3, %v24_v3  ;;  %p106_p8 = scmp.ne.s32.totalorder %s51_s18, %s105_s19  ;;  %p110_p9 = scmp.lt.s32.totalorder %s51_s18, %s51_s18 }
  0x16   :  { %v39_v22 = vsub.s32 %v36_v17, %v38_v18  ;;  %p111_p10 = scmp.lt.s32.totalorder %s109_s20, %s105_s19 }
  0x17   :  { %v27_v6 = vmul.f32 %v25_v4, %v23_v2  ;;  %v28_v7 = vmul.f32 %v26_v5, %v24_v3 }
  0x18   :  { %p112_p11 = por %p111_p10, %p110_p9 }
  0x19   :  { %v29_v8 = vadd.f32 %v28_v7, %v27_v6 }
  0x1a   :  { %p113_p12 = pnand %p112_p11, %p106_p8 }
  0x1b   :  { %30 = vadd.xlane.f32.xlu0 %v29_v8 }
  0xa8   :  { %v31_v9 = vpop.xlane.xlu0 %30 }
  0xa9   :  { %v32_v10 = vmul.f32 0.00390625, %v31_v9 }
  0xab   :  { %v61_v11 = vand.u32 2147483647, %v32_v10  ;;  %v65_v15 = vand.u32 2147483648, %v32_v10  ;;  %vm60_vm2 = vcmp.lt.f32.partialorder %v32_v10, 0.0  ;;  %vm59_vm3 = vcmp.eq.f32.partialorder %v32_v10, 0.0 }
  0xad   :  { %79 = vlog2.f32 %v61_v11  ;;  %vm69_vm0 = vweird.f32 %v61_v11  ;;  %vm71_vm1 = vcmp.eq.f32.partialorder %v61_v11, 0.0  ;;  %vm62_vm4 = vcmp.eq.f32.partialorder %v61_v11, inf }
  0xb7   :  { %v80_v12 = vpop.eup %79 }
  0xb8   :  { %v66_v13 = vmul.f32 0.33333334, %v80_v12 }
  0xba   :  { %81 = vpow2.f32 %v66_v13 }
  0xc4   :  { %v82_v16 = vpop.eup %81 }
  0xc5   :  { %v68_v19 = vor.u32 %v82_v16, %v65_v15 }
  0xc7   :  { %v70_v20 = vsel %vm69_vm0, %v32_v10, %v68_v19 }
  0xc8   :  { %v73_v21 = vsel %vm71_vm1, %v65_v15, %v70_v20 }
  0xc9   :  { %v74_v23 = vsel %vm60_vm2, nan, %v73_v21 }
  0xca   :  { %v75_v24 = vsel %vm59_vm3, 0.0, %v74_v23 }
  0xcb   :  { %v76_v25 = vsel %vm62_vm4, inf, %v75_v24 }
  0xcc   :  { %v40_v26 = vrot.slane %v76_v25, %v39_v22 }
  0xce   :  { %43 = vst.msk [vmem:[#allocation5] sm:$0x1] %vm42_vm5, %v40_v26 }
  0xcf   :  { %116 = shalt.err (!%p113_p12)
}
  0xd0   :  { %s117_s23 = scalar_lea.hbm %s168_s1, 16 }
  0xd1   :  { %p118_p13 = scmp.ne.s32.totalorder %s168_s1, %s117_s23  ;;  %p121_p0 = scmp.lt.u32.totalorder %s117_s23, %s168_s1 }
  0xd3   :  { %p123_p1 = pnand %p121_p0, %p118_p13 }
  0xd5   :  { %126 = shalt.err (!%p123_p1)
}
  0xd6   :  { %53 = dma.vmem_to_hbm [thread:$0]  %s51_s18, 16, %s168_s1, [#allocation4]  }
  0xd7   :  { %129 = dma.done.wait [#allocation4], 16  }
  0xd8   :  { %130 = vsyncadd [#allocation4], 4294967280 }
  0xd9   :  { %57 = vsyncpa [#allocation3], 1 }
  0xda   :  { %58 = vsyncpa [#allocation4], 1 }

</bundles_post_ra>
